<compile_context>
chip_gen: v7x
topology: tpu7x:2x2x1
jax: 0.10.0
libtpu: 0.0.40
codegen_flags: <defaults>
</compile_context>

<pallas_src>
import jax
import jax.numpy as jnp
from jax.experimental import pallas as pl
from jax.experimental.pallas import tpu as pltpu


def _make_sap_kernel(has_mask: bool, gate_rows: bool, total_rows: int, nb: int):
    """Build the kernel body for one (mask present?, partial tail block?) variant."""

    def kernel(*refs):
        if has_mask:
            x_ref, w_ref, m_ref, o_ref = refs
        else:
            x_ref, w_ref, o_ref = refs

        x = x_ref[...]                                   # (nb, T, H), input dtype
        w_col = w_ref[...]                               # (H, 1),     input dtype
        blk, t, h = x.shape

        # ---- logits on the MXU: (nb*T, H) @ (H, 1) -> (nb, T), f32 accumulation ----
        logits = jax.lax.dot_general(
            x.reshape(blk * t, h), w_col,
            dimension_numbers=(((1,), (0,)), ((), ())),
            preferred_element_type=jnp.float32,
            precision=jax.lax.Precision.HIGHEST,
        ).reshape(blk, t)

        if has_mask:
            logits = logits + m_ref[...].astype(jnp.float32)

        if gate_rows:
            # Last block may hang past N.  Those rows are discarded on the output
            # writeback, but keep their logits finite/defined (garbage stays per-row).
            row = pl.program_id(0) * nb + jax.lax.broadcasted_iota(
                jnp.int32, (blk, t), 0)
            logits = jnp.where(row < total_rows, logits, 0.0)

        # ---- numerically stable softmax over T (T on lanes), exact normalization ----
        mx = jnp.max(logits, axis=-1, keepdims=True)     # (nb, 1)
        e = jnp.exp(logits - mx)                         # (nb, T) f32
        s = jnp.sum(e, axis=-1, keepdims=True)           # (nb, 1)
        att = e * (1.0 / s)                              # (nb, T) f32, exact divide

        # ---- weighted pooling on the MXU: (nb,1,T) @ (nb,T,H) -> (nb,1,H) f32 ----
        rep = jax.lax.dot_general(
            att.astype(x.dtype)[:, None, :], x,
            dimension_numbers=(((2,), (1,)), ((0,), (0,))),
            preferred_element_type=jnp.float32,
            precision=jax.lax.Precision.HIGHEST,
        )
        o_ref[...] = rep[:, 0, :].astype(o_ref.dtype)

    return kernel


def self_attention_pooling(inp, w, b=None, att_mask=None, *,
                           block_n=None, block_bytes=8 * 1024 * 1024):
    """inp: (N, T, H); w: (H, 1) Linear weight; b: scalar Linear bias (a uniform logit
    shift, mathematically cancelled by softmax -> never DMA'd); att_mask: optional
    (N, T) additive logit mask.  Returns (N, H) in inp.dtype."""
    N, T, H = inp.shape
    del b  # softmax is shift-invariant; the scalar bias cannot affect the output.
    w_col = jnp.asarray(w).reshape(H, 1).astype(inp.dtype)
    itemsize = jnp.dtype(inp.dtype).itemsize
    sublane = 8 * max(1, 4 // itemsize)      # 8 f32 / 16 bf16 / 32 int8-fp8 rows

    if block_n is None:
        nb = max(1, min(N, block_bytes // (T * H * itemsize)))
        # Keep >= 2 grid steps (v7x megacore) when it doesn't cost sublane alignment.
        if nb >= N and N > 2 * sublane:
            nb = pl.cdiv(N, 2)
        if nb > sublane:
            nb = (nb // sublane) * sublane   # sublane-dense out/mask blocks
        nb = max(1, min(nb, N))
    else:
        nb = max(1, min(int(block_n), N))

    grid = (pl.cdiv(N, nb),)
    gate_rows = (N % nb) != 0                # partial tail block (no host-side padding)

    kernel = _make_sap_kernel(att_mask is not None, gate_rows, N, nb)

    in_specs = [
        pl.BlockSpec((nb, T, H), lambda i: (i, 0, 0)),   # streamed input block
        pl.BlockSpec((H, 1), lambda i: (0, 0)),          # resident weight column
    ]
    args = [inp, w_col]
    if att_mask is not None:
        in_specs.append(pl.BlockSpec((nb, T), lambda i: (i, 0)))
        args.append(att_mask)                            # native dtype; f32 cast in-kernel

    # Double-buffered input block + mask/out/weight: raise the scoped-VMEM limit off the
    # v5e 16 MiB default, scale with the block, stay under v7x's 64 MiB physical VMEM.
    x_block_bytes = nb * T * H * itemsize
    vmem_limit = int(min(56 * 2**20, max(32 * 2**20, 3 * x_block_bytes + 4 * 2**20)))

    return pl.pallas_call(
        kernel,
        out_shape=jax.ShapeDtypeStruct((N, H), inp.dtype),
        grid=grid,
        in_specs=in_specs,
        out_specs=pl.BlockSpec((nb, H), lambda i: (i, 0)),
        compiler_params=pltpu.CompilerParams(
            dimension_semantics=("parallel",),
            vmem_limit_bytes=vmem_limit,
        ),
    )(*args)


def _reference(inp, w, b, att_mask=None):
    logits = jnp.einsum(
        "nth,ho->nt", inp.astype(jnp.float32), jnp.asarray(w).astype(jnp.float32),
        precision=jax.lax.Precision.HIGHEST) + b
    if att_mask is not None:
        logits = logits + att_mask.astype(jnp.float32)
    att = jax.nn.softmax(logits, axis=-1)[..., None]
    return jnp.sum(inp.astype(jnp.float32) * att, axis=1).astype(inp.dtype)


if __name__ == "__main__":
    key = jax.random.PRNGKey(0)
    k_x, k_w, k_b, k_m, k_x2, k_m2 = jax.random.split(key, 6)

    T, H = 8, 32
    bound = 1.0 / (H ** 0.5)                 # nn.Linear(H, 1) default init range
    w = jax.random.uniform(k_w, (H, 1), minval=-bound, maxval=bound, dtype=jnp.float32)
    b = jax.random.uniform(k_b, (), minval=-bound, maxval=bound, dtype=jnp.float32)

    # Case 1: small batch (full-array blocks), masked and unmasked.
    N = 2
    inp = jax.random.normal(k_x, (N, T, H), dtype=jnp.float32)
    att_mask = jax.random.normal(k_m, (N, T), dtype=jnp.float32)

    out_m = jax.block_until_ready(self_attention_pooling(inp, w, b, att_mask))
    assert out_m.shape == (N, H)
    assert jnp.allclose(out_m, _reference(inp, w, b, att_mask), atol=1e-3, rtol=1e-3), \
        "mismatch vs reference (masked)"

    out_nm = jax.block_until_ready(self_attention_pooling(inp, w, b, None))
    assert jnp.allclose(out_nm, _reference(inp, w, b, None), atol=1e-3, rtol=1e-3), \
        "mismatch vs reference (no mask)"

    # Case 2: multi-block grid with a partial last block (N=20, nb=8 -> grid=(3,),
    # last block holds only 4 valid rows).  No host-side padding copy is made.
    N2 = 20
    inp2 = jax.random.normal(k_x2, (N2, T, H), dtype=jnp.float32)
    mask2 = jax.random.normal(k_m2, (N2, T), dtype=jnp.float32)

    out2 = jax.block_until_ready(self_attention_pooling(inp2, w, b, mask2, block_n=8))
    assert out2.shape == (N2, H)
    assert jnp.allclose(out2, _reference(inp2, w, b, mask2), atol=1e-3, rtol=1e-3), \
        "mismatch vs reference (masked, partial tail block)"

    out2_nm = jax.block_until_ready(self_attention_pooling(inp2, w, b, None, block_n=8))
    assert jnp.allclose(out2_nm, _reference(inp2, w, b, None), atol=1e-3, rtol=1e-3), \
        "mismatch vs reference (no mask, partial tail block)"

    print("KERNEL_OK")
</pallas_src>

<mosaic_0001>
module attributes {stable_mosaic.version = 11 : i64} {
  func.func @kernel(%arg0: i32, %arg1: memref<2x8x32xf32, #tpu.memory_space<vmem>>, %arg2: memref<32x1xf32, #tpu.memory_space<vmem>>, %arg3: memref<2x8xf32, #tpu.memory_space<vmem>>, %arg4: memref<2x32xf32, #tpu.memory_space<vmem>>) attributes {dimension_semantics = [#tpu.dimension_semantics<parallel>], iteration_bounds = array<i64: 1>, scalar_prefetch = 0 : i64, scratch_operands = 0 : i64, tpu.core_type = #tpu.core_type<tc>, window_params = [{transform_indices = @transform_0, window_bounds = array<i64: 2, 8, 32>}, {pipeline_mode = #tpu.pipeline_mode<synchronous>, transform_indices = @transform_1, window_bounds = array<i64: 32, 1>}, {transform_indices = @transform_2, window_bounds = array<i64: 2, 8>}, {transform_indices = @transform_3, window_bounds = array<i64: 2, 32>}]} {
    %c0 = arith.constant 0 : index
    %c0_0 = arith.constant 0 : index
    %c0_1 = arith.constant 0 : index
    %0 = vector.load %arg1[%c0, %c0_0, %c0_1] : memref<2x8x32xf32, #tpu.memory_space<vmem>>, vector<2x8x32xf32>
    %c0_2 = arith.constant 0 : index
    %c0_3 = arith.constant 0 : index
    %1 = vector.load %arg2[%c0_2, %c0_3] : memref<32x1xf32, #tpu.memory_space<vmem>>, vector<32x1xf32>
    %2 = vector.shape_cast %0 : vector<2x8x32xf32> to vector<16x32xf32>
    %cst = arith.constant dense<0.000000e+00> : vector<16x1xf32>
    %3 = tpu.matmul %2, %1, %cst {dimension_numbers = #tpu.dot_dimension_numbers<[1], [0], [0], [1], [0, 0, 1, 1], [], []>, precision = #tpu.contract_precision<fp32>} : vector<16x32xf32>, vector<32x1xf32>, vector<16x1xf32> -> vector<16x1xf32>
    %4 = vector.shape_cast %3 : vector<16x1xf32> to vector<2x8xf32>
    %c0_4 = arith.constant 0 : index
    %c0_5 = arith.constant 0 : index
    %5 = vector.load %arg3[%c0_4, %c0_5] : memref<2x8xf32, #tpu.memory_space<vmem>>, vector<2x8xf32>
    %6 = arith.addf %4, %5 : vector<2x8xf32>
    %cst_6 = arith.constant dense<0xFF800000> : vector<2xf32>
    %7 = vector.multi_reduction <maximumf>, %6, %cst_6 [1] : vector<2x8xf32> to vector<2xf32>
    %8 = vector.shape_cast %7 : vector<2xf32> to vector<2x1xf32>
    %9 = vector.broadcast %8 : vector<2x1xf32> to vector<2x8xf32>
    %10 = arith.subf %6, %9 : vector<2x8xf32>
    %11 = math.exp %10 : vector<2x8xf32>
    %cst_7 = arith.constant dense<0.000000e+00> : vector<2xf32>
    %12 = vector.multi_reduction <add>, %11, %cst_7 [1] : vector<2x8xf32> to vector<2xf32>
    %13 = vector.shape_cast %12 : vector<2xf32> to vector<2x1xf32>
    %cst_8 = arith.constant 1.000000e+00 : f32
    %14 = vector.broadcast %cst_8 : f32 to vector<2x1xf32>
    %15 = arith.divf %14, %13 : vector<2x1xf32>
    %16 = vector.broadcast %15 : vector<2x1xf32> to vector<2x8xf32>
    %17 = arith.mulf %11, %16 : vector<2x8xf32>
    %18 = vector.shape_cast %17 : vector<2x8xf32> to vector<2x1x8xf32>
    %cst_9 = arith.constant dense<0.000000e+00> : vector<2x1x32xf32>
    %19 = tpu.matmul %18, %0, %cst_9 {dimension_numbers = #tpu.dot_dimension_numbers<[2], [1], [1], [2], [0, 0, 0, 1, 1, 2], [0], [0]>, precision = #tpu.contract_precision<fp32>} : vector<2x1x8xf32>, vector<2x8x32xf32>, vector<2x1x32xf32> -> vector<2x1x32xf32>
    %20 = vector.shape_cast %19 : vector<2x1x32xf32> to vector<2x32xf32>
    %c0_10 = arith.constant 0 : index
    %c0_11 = arith.constant 0 : index
    %21 = vector.load %arg4[%c0_10, %c0_11] : memref<2x32xf32, #tpu.memory_space<vmem>>, vector<2x32xf32>
    tpu.vector_store %arg4[%c0_10, %c0_11], %20 {strides = array<i32>} : memref<2x32xf32, #tpu.memory_space<vmem>>, vector<2x32xf32>,
    return
  }
  func.func @transform_0(%arg0: i32) -> (i32, i32, i32) {
    %c0_i32 = arith.constant 0 : i32
    %c0_i32_0 = arith.constant 0 : i32
    %c0_i32_1 = arith.constant 0 : i32
    return %arg0, %c0_i32, %c0_i32_0 : i32, i32, i32
  }
  func.func @transform_1(%arg0: i32) -> (i32, i32) {
    %c0_i32 = arith.constant 0 : i32
    %c0_i32_0 = arith.constant 0 : i32
    %c0_i32_1 = arith.constant 0 : i32
    return %c0_i32, %c0_i32_0 : i32, i32
  }
  func.func @transform_2(%arg0: i32) -> (i32, i32) {
    %c0_i32 = arith.constant 0 : i32
    %c0_i32_0 = arith.constant 0 : i32
    return %arg0, %c0_i32 : i32, i32
  }
  func.func @transform_3(%arg0: i32) -> (i32, i32) {
    %c0_i32 = arith.constant 0 : i32
    %c0_i32_0 = arith.constant 0 : i32
    return %arg0, %c0_i32 : i32, i32
  }
}

</mosaic_0001>

<bundles_post_ra>
// kernel: tpu_custom_call.1
= control target key start
LH: loop header
LB: loop body
LE: loop exit
PB: predicated region body
PF: predicated region fallthrough
CT: control target
= control target key end

     0   :  { %vm21_vm0 = vcmask 261120   ;;  %v558_v3 = vlaneseq  ;;  %s2044_s0 = inlined_call_operand.vmem [shape: f32[2,8,32], index: 0, kind: input, shape index: {}]   ;;  %s2045_s1 = inlined_call_operand.vmem [shape: f32[32,1], index: 1, kind: input, shape index: {}]   ;;  %s2046_s2 = inlined_call_operand.vmem [shape: f32[2,8], index: 2, kind: input, shape index: {}]   ;;  %s2047_s3 = inlined_call_operand.hbm [shape: f32[2,32], index: 3, kind: output, shape index: {}]  }
   0x1   :  { %v17_v0 = vld [vmem:[%s2045_s1] sm:$0xff]  ;;  %v18_v1 = vld [vmem:[%s2045_s1 + $0x8] sm:$0xff]  ;;  %v19_v2 = vld [vmem:[%s2045_s1 + $0x10] sm:$0xff] }
   0x2   :  { %v29_v4 = vand.u32 4294901760, %v17_v0  ;;  %v32_v5 = vand.u32 4294901760, %v18_v1  ;;  %v20_v6 = vld [vmem:[%s2045_s1 + $0x18] sm:$0xff]  ;;  %v35_v7 = vand.u32 4294901760, %v19_v2  ;;  %v1927_v8 = vld [vmem:[%s2044_s0] sm:$0xff]  ;;  %v1932_v9 = vld [vmem:[%s2044_s0 + $0x8] sm:$0xff] }
   0x3   :  { %v38_v10 = vand.u32 4294901760, %v20_v6  ;;  %v23_v11 = vsel %vm21_vm0, %v1927_v8, 0  ;;  %v26_v12 = vsel %vm21_vm0, %v1932_v9, 0  ;;  %v559_v13 = vshrl.u32 %v558_v3, 7 }
   0x4   :  { %v1936_v14 = vpack.c.bf16 %v32_v5, %v29_v4  ;;  %v1938_v15 = vand.u32 4294901760, %v23_v11  ;;  %v1940_v16 = vand.u32 4294901760, %v26_v12  ;;  %v119_v17 = vsub.f32 %v17_v0, %v29_v4 }
   0x5   :  { %8 = vsyncpa [#allocation3], 0  ;;  %v1942_v18 = vpack.c.bf16 %v38_v10, %v35_v7  ;;  %v126_v19 = vsub.f32 %v18_v1, %v32_v5  ;;  %v133_v20 = vsub.f32 %v19_v2, %v35_v7  ;;  %v140_v21 = vsub.f32 %v20_v6, %v38_v10  ;;  %v556_v32 = vld [vmem:[%s2046_s2] sm:$0x3]  ;;  %s1891_s2 = smov [#allocation2]  }
   0x6   :  { %1775 = vmatprep.subr.bf16.mxu0 %v1936_v14  ;;  %v98_v22 = vsub.f32 %v23_v11, %v1938_v15  ;;  %v108_v23 = vsub.f32 %v26_v12, %v1940_v16  ;;  %v120_v24 = vand.u32 4294901760, %v119_v17  ;;  %v1948_v28 = vsub.s32 0, %v559_v13  ;;  %s1580_s24 = sshll.u32 %s1891_s2, 4  ;;  %s1581_s24 = int_to_ptr.vmem [resolvable:$true] %s1580_s24 }
   0x7   :  { %1777 = vmatpush3.bf16.msra.mxu0 %v1936_v14  ;;  %v127_v25 = vand.u32 4294901760, %v126_v19  ;;  %v134_v26 = vand.u32 4294901760, %v133_v20  ;;  %v141_v27 = vand.u32 4294901760, %v140_v21  ;;  %v585_v45 = vand.u32 127, %v558_v3  ;;  %s1864_s25 = scalar_lea.vmem %s1581_s24, 32  ;;  %p1869_p1 = scmp.lt.s32.totalorder %s1581_s24, %s1581_s24 }
   0x8   :  { %1779 = vmatprep.subr.bf16.mxu0 %v1942_v18  ;;  %v99_v29 = vand.u32 4294901760, %v98_v22  ;;  %v109_v30 = vand.u32 4294901760, %v108_v23  ;;  %v121_v31 = vsub.f32 %v119_v17, %v120_v24  ;;  %v561_v42 = vrot.slane %v556_v32, %v1948_v28  ;;  %p1865_p0 = scmp.ne.s32.totalorder %s1581_s24, %s1864_s25  ;;  %p1870_p2 = scmp.lt.s32.totalorder %s1864_s25, %s1864_s25 }
   0x9   :  { %v128_v33 = vsub.f32 %v126_v19, %v127_v25  ;;  %v135_v34 = vsub.f32 %v133_v20, %v134_v26  ;;  %v142_v35 = vsub.f32 %v140_v21, %v141_v27  ;;  %v1956_v46 = vsub.s32 1, %v559_v13 }
   0xa   :  { %v100_v36 = vsub.f32 %v98_v22, %v99_v29  ;;  %v110_v37 = vsub.f32 %v108_v23, %v109_v30  ;;  %v122_v38 = vand.u32 4294901760, %v121_v31  ;;  %563 = vbcast.lane.b32.xlu0 %v561_v42, 256  ;;  %v1958_v49 = vsub.s32 %v585_v45, %v559_v13  ;;  %p1871_p3 = por %p1870_p2, %p1869_p1 }
   0xb   :  { %1781 = vmatpush3.bf16.msra.mxu0 %v1942_v18  ;;  %v129_v39 = vand.u32 4294901760, %v128_v33  ;;  %v136_v40 = vand.u32 4294901760, %v135_v34  ;;  %v143_v41 = vand.u32 4294901760, %v142_v35  ;;  %v568_v50 = vrot.slane %v556_v32, %v1956_v46 }
   0xc   :  { %v101_v43 = vand.u32 4294901760, %v100_v36  ;;  %v111_v44 = vand.u32 4294901760, %v110_v37  ;;  %v1790_v51 = vpack.c.bf16 %v126_v19, %v119_v17  ;;  %v1794_v52 = vpack.c.bf16 %v140_v21, %v133_v20  ;;  %p1872_p4 = pnand %p1871_p3, %p1865_p0 }
   0xd   :  { %v1782_v47 = vpack.c.bf16 %v129_v39, %v122_v38  ;;  %v1786_v48 = vpack.c.bf16 %v143_v41, %v136_v40  ;;  %v1806_v53 = vpack.c.bf16 %v127_v25, %v120_v24  ;;  %v1810_v54 = vpack.c.bf16 %v141_v27, %v134_v26 }
   0xe   :  { %1656 = vmatprep.mubr.f32.mxu0 %v101_v43  ;;  %570 = vbcast.lane.b32.xlu0 %v568_v50, 256  ;;  %v1888_v55 = vmov 0   ;;  %vm594_vm1 = vcmask 1041409   ;;  %vm597_vm2 = vcmask 58368   ;;  %v666_v27 = vand.u32 4294901760, %v1927_v8 }
   0xf   :  { %1657 = vmatmul.mubr.f32.vlgmr.msra.gmra.mrb[0].mxu0 %v111_v44  ;;  %1783 = vmatprep.subr.bf16.mxu0 %v1782_v47  ;;  %vm1890_vm3 = vmmov 0   ;;  %vm662_vm4 = vcmask 64512   ;;  %v1122_v43 = vand.u32 4294901760, %v1932_v9  ;;  %vm1572_vm5 = vcmask 254976  }
  0x10   :  { %1785 = vmatpush3.bf16.msra.mxu0 %v1782_v47  ;;  %1667 = vmatprep.mubr.f32.mxu0 %v1938_v15 }
  0x11   :  { %1787 = vmatprep.subr.bf16.mxu0 %v1786_v48  ;;  %1856 = vset.pattern.permute.xlu1 %v1888_v55  ;;  %v1199_v45 = vsub.f32 %v1932_v9, %v1122_v43 }
  0x12   :  { %1857 = vset.pattern.permute.xlu0 %v1888_v55 }
  0x13   :  { %v1200_v47 = vand.u32 4294901760, %v1199_v45 }
  0x14   :  { %1789 = vmatpush3.bf16.msra.mxu0 %v1786_v48 }
  0x15   :  { %1791 = vmatprep.subr.bf16.mxu0 %v1790_v51 }
  0x17   :  { %1668 = vmatmul.mubr.f32.vlgmr.msra.gmra.mrb[0].mxu0 %v1940_v16 }
  0x18   :  { %1793 = vmatpush3.bf16.msra.mxu0 %v1790_v51  ;;  %1678 = vmatprep.mubr.f32.mxu0 %v98_v22 }
  0x19   :  { %1795 = vmatprep.subr.bf16.mxu0 %v1794_v52 }
  0x1c   :  { %1797 = vmatpush3.bf16.msra.mxu0 %v1794_v52 }
  0x1d   :  { %1799 = vmatprep.subr.bf16.mxu0 %v1936_v14 }
  0x1f   :  { %1679 = vmatmul.mubr.f32.vlgmr.msra.gmra.mrb[0].mxu0 %v108_v23 }
  0x20   :  { %1801 = vmatpush3.bf16.msra.mxu0 %v1936_v14  ;;  %1689 = vmatprep.mubr.f32.mxu0 %v99_v29  ;;  %v1889_v29 = vmov 0.0  }
  0x21   :  { %1803 = vmatprep.subr.bf16.mxu0 %v1942_v18  ;;  %1714 = vmatprep.subr.mxu1 %v1889_v29 }
  0x22   :  { %1716 = vmatprep.mubr.msk.f32.mxu1 %vm1890_vm3, %v1889_v29  ;;  %1715 = vmatpush3.msra.mxu1 %v666_v27 }
  0x23   :  { %1719 = vmatprep.subr.mxu1 %v1889_v29 }
  0x24   :  { %1805 = vmatpush3.bf16.msra.mxu0 %v1942_v18 }
  0x25   :  { %1807 = vmatprep.subr.bf16.mxu0 %v1806_v53 }
  0x27   :  { %1690 = vmatmul.mubr.f32.vlgmr.msra.gmra.mrb[0].mxu0 %v109_v30  ;;  %v743_v30 = vsub.f32 %v1927_v8, %v666_v27 }
  0x28   :  { %1809 = vmatpush3.bf16.msra.mxu0 %v1806_v53  ;;  %1700 = vmatprep.mubr.f32.mxu0 %v1938_v15 }
  0x29   :  { %1811 = vmatprep.subr.bf16.mxu0 %v1810_v54  ;;  %v744_v33 = vand.u32 4294901760, %v743_v30 }
  0x2b   :  { %v745_v36 = vsub.f32 %v743_v30, %v744_v33 }
  0x2c   :  { %1813 = vmatpush3.bf16.msra.mxu0 %v1810_v54 }
  0x2d   :  { %1815 = vmatprep.subr.bf16.mxu0 %v1936_v14  ;;  %v746_v39 = vand.u32 4294901760, %v745_v36 }
  0x2f   :  { %1701 = vmatmul.mubr.f32.vlgmr.msra.gmra.mrb[0].mxu0 %v1940_v16 }
  0x30   :  { %1817 = vmatpush3.bf16.msra.mxu0 %v1936_v14  ;;  %1711 = vmatprep.mubr.f32.mxu0 %v1938_v15 }
  0x31   :  { %1819 = vmatprep.subr.bf16.mxu0 %v1942_v18 }
  0x34   :  { %1821 = vmatpush3.bf16.msra.mxu0 %v1942_v18 }
  0x37   :  { %1712 = vmatmul.mubr.f32.vlgmr.msra.gmra.mrb[0].mxu0 %v1940_v16 }
  0x7c   :  { %v564_v56 = vpop.permute.xlu0 %563 }
  0x80   :  { %v571_v60 = vpop.permute.xlu0 %570 }
 0x10a   :  { %v1713_v57 = vpop.f32.mrb[0].mxu0 }
 0x10b   :  { %v546_v58 = vpop.f32.mrb[1].mxu0  ;;  %v575_v61 = vadd.f32 %v1713_v57, %v571_v60 }
 0x10c   :  { %v574_v59 = vadd.f32 %v564_v56, %v546_v58 }
 0x10e   :  { %579 = vperm.xlu1 %1856, %v574_v59  }
 0x112   :  { %582 = vperm.xlu1 %1856, %v575_v61  }
 0x18d   :  { %v580_v62 = vpop.permute.xlu1 %579 }
 0x18e   :  { %v589_v0 = vrot.slane %v580_v62, %v1958_v49 }
 0x191   :  { %v583_v63 = vpop.permute.xlu1 %582 }
 0x192   :  { %v593_v1 = vrot.slane %v583_v63, %v1958_v49 }
 0x194   :  { %v595_v2 = vsel %vm594_vm1, %v593_v1, %v589_v0 }
 0x195   :  { %v598_v3 = vsel %vm597_vm2, %v595_v2, -inf }
 0x196   :  { %599 = vmax.xlane.f32.xlu0 %v598_v3 }
 0x223   :  { %v600_v4 = vpop.xlane.xlu0 %599 }
 0x224   :  { %v605_v5 = vrot.slane %v600_v4, %v1948_v28  ;;  %v609_v6 = vrot.slane %v600_v4, %v1956_v46 }
 0x226   :  { %v612_v7 = vsub.f32 %v574_v59, %v605_v5  ;;  %v613_v10 = vsub.f32 %v575_v61, %v609_v6 }
 0x228   :  { %v614_v11 = vmul.f32 1.442695, %v612_v7  ;;  %v616_v12 = vmul.f32 1.442695, %v613_v10 }
 0x22a   :  { %1858 = vpow2.f32 %v614_v11 }
 0x22b   :  { %1860 = vpow2.f32 %v616_v12 }
 0x234   :  { %v1859_v13 = vpop.eup %1858 }
 0x235   :  { %621 = vperm.xlu1 %1856, %v1859_v13   ;;  %v1861_v14 = vpop.eup %1860 }
 0x239   :  { %624 = vperm.xlu1 %1856, %v1861_v14  }
 0x2b4   :  { %v622_v15 = vpop.permute.xlu1 %621 }
 0x2b5   :  { %v629_v17 = vrot.slane %v622_v15, %v1958_v49 }
 0x2b8   :  { %v625_v16 = vpop.permute.xlu1 %624 }
 0x2b9   :  { %v633_v18 = vrot.slane %v625_v16, %v1958_v49 }
 0x2bb   :  { %v634_v19 = vsel %vm594_vm1, %v633_v18, %v629_v17 }
 0x2bc   :  { %v636_v20 = vsel %vm597_vm2, %v634_v19, 0.0 }
 0x2bd   :  { %637 = vadd.xlane.f32.xlu1 %v636_v20 }
 0x34a   :  { %v638_v21 = vpop.xlane.xlu1 %637 }
 0x34b   :  { %1862 = vrcp.f32 %v638_v21 }
 0x355   :  { %v1863_v22 = vpop.eup %1862 }
 0x356   :  { %v649_v23 = vrot.slane %v1863_v22, %v1956_v46  ;;  %v645_v24 = vrot.slane %v1863_v22, %v1948_v28 }
 0x358   :  { %v653_v25 = vmul.f32 %v1861_v14, %v649_v23  ;;  %v652_v26 = vmul.f32 %v1859_v13, %v645_v24 }
 0x35a   :  { %1113 = vperm.xlu1 %1856, %v653_v25   ;;  %656 = vperm.xlu0 %1857, %v652_v26  }
 0x3d9   :  { %v657_v28 = vpop.permute.xlu0 %656  ;;  %v1114_v8 = vpop.permute.xlu1 %1113 }
 0x3da   :  { %v661_v31 = vrot.slane %v657_v28, %v1958_v49  ;;  %v1118_v41 = vrot.slane %v1114_v8, %v1958_v49  ;;  %v1201_v49 = vsub.f32 %v1199_v45, %v1200_v47 }
 0x3dc   :  { %v663_v32 = vsel %vm662_vm4, %v661_v31, 0  ;;  %v1119_v42 = vsel %vm662_vm4, %v1118_v41, 0  ;;  %v1202_v51 = vand.u32 4294901760, %v1201_v49 }
 0x3dd   :  { %v731_v34 = vand.u32 4294901760, %v663_v32  ;;  %v1187_v44 = vand.u32 4294901760, %v1119_v42 }
 0x3df   :  { %v732_v35 = vsub.f32 %v663_v32, %v731_v34  ;;  %v1188_v46 = vsub.f32 %v1119_v42, %v1187_v44 }
 0x3e1   :  { %v733_v37 = vand.u32 4294901760, %v732_v35  ;;  %v1189_v48 = vand.u32 4294901760, %v1188_v46 }
 0x3e3   :  { %v734_v38 = vsub.f32 %v732_v35, %v733_v37  ;;  %v1190_v50 = vsub.f32 %v1188_v46, %v1189_v48 }
 0x3e5   :  { %v735_v40 = vand.u32 4294901760, %v734_v38  ;;  %v1191_v52 = vand.u32 4294901760, %v1190_v50 }
 0x3e7   :  { %1717 = vmatmul.mubr.f32.vlgmr.msra.gmra.mrb[0].mxu1 %v735_v40 }
 0x3e8   :  { %1720 = vmatpush3.msra.mxu1 %v746_v39  ;;  %1721 = vmatprep.mubr.msk.f32.mxu1 %vm1890_vm3, %v1889_v29 }
 0x3e9   :  { %1724 = vmatprep.subr.mxu1 %v1889_v29 }
 0x3ef   :  { %1722 = vmatmul.mubr.f32.vlgmr.msra.gmra.mrb[0].mxu1 %v731_v34 }
 0x3f0   :  { %1725 = vmatpush3.msra.mxu1 %v743_v30  ;;  %1726 = vmatprep.mubr.msk.f32.mxu1 %vm1890_vm3, %v1889_v29 }
 0x3f1   :  { %1729 = vmatprep.subr.mxu1 %v1889_v29 }
 0x3f7   :  { %1727 = vmatmul.mubr.f32.vlgmr.msra.gmra.mrb[0].mxu1 %v732_v35 }
 0x3f8   :  { %1730 = vmatpush3.msra.mxu1 %v666_v27  ;;  %1731 = vmatprep.mubr.msk.f32.mxu1 %vm1890_vm3, %v1889_v29 }
 0x3f9   :  { %1734 = vmatprep.subr.mxu1 %v1889_v29 }
 0x3ff   :  { %1732 = vmatmul.mubr.f32.vlgmr.msra.gmra.mrb[0].mxu1 %v733_v37 }
 0x400   :  { %1735 = vmatpush3.msra.mxu1 %v744_v33  ;;  %1736 = vmatprep.mubr.msk.f32.mxu1 %vm1890_vm3, %v1889_v29 }
 0x401   :  { %1739 = vmatprep.subr.mxu1 %v1889_v29 }
 0x407   :  { %1737 = vmatmul.mubr.f32.vlgmr.msra.gmra.mrb[0].mxu1 %v731_v34 }
 0x408   :  { %1740 = vmatpush3.msra.mxu1 %v666_v27  ;;  %1741 = vmatprep.mubr.msk.f32.mxu1 %vm1890_vm3, %v1889_v29 }
 0x409   :  { %1744 = vmatprep.subr.mxu1 %v1889_v29 }
 0x40f   :  { %1742 = vmatmul.mubr.f32.vlgmr.msra.gmra.mrb[0].mxu1 %v731_v34 }
 0x410   :  { %1745 = vmatpush3.msra.mxu1 %v1122_v43  ;;  %1746 = vmatprep.mubr.msk.f32.mxu1 %vm1890_vm3, %v1889_v29 }
 0x411   :  { %1749 = vmatprep.subr.mxu1 %v1889_v29 }
 0x413   :  { %1747 = vmatmul.mubr.f32.vlgmr.msra.gmra.mrb[2].mxu1 %v1191_v52 }
 0x414   :  { %1750 = vmatpush3.msra.mxu1 %v1202_v51  ;;  %1751 = vmatprep.mubr.msk.f32.mxu1 %vm1890_vm3, %v1889_v29 }
 0x415   :  { %1754 = vmatprep.subr.mxu1 %v1889_v29 }
 0x41b   :  { %1752 = vmatmul.mubr.f32.vlgmr.msra.gmra.mrb[2].mxu1 %v1187_v44 }
 0x41c   :  { %1755 = vmatpush3.msra.mxu1 %v1199_v45  ;;  %1756 = vmatprep.mubr.msk.f32.mxu1 %vm1890_vm3, %v1889_v29 }
 0x41d   :  { %1759 = vmatprep.subr.mxu1 %v1889_v29 }
 0x423   :  { %1757 = vmatmul.mubr.f32.vlgmr.msra.gmra.mrb[2].mxu1 %v1188_v46 }
 0x424   :  { %1760 = vmatpush3.msra.mxu1 %v1122_v43  ;;  %1761 = vmatprep.mubr.msk.f32.mxu1 %vm1890_vm3, %v1889_v29 }
 0x425   :  { %1764 = vmatprep.subr.mxu1 %v1889_v29 }
 0x42b   :  { %1762 = vmatmul.mubr.f32.vlgmr.msra.gmra.mrb[2].mxu1 %v1189_v48 }
 0x42c   :  { %1765 = vmatpush3.msra.mxu1 %v1200_v47  ;;  %1766 = vmatprep.mubr.msk.f32.mxu1 %vm1890_vm3, %v1889_v29 }
 0x42d   :  { %1769 = vmatprep.subr.mxu1 %v1889_v29 }
 0x433   :  { %1767 = vmatmul.mubr.f32.vlgmr.msra.gmra.mrb[2].mxu1 %v1187_v44 }
 0x434   :  { %1770 = vmatpush3.msra.mxu1 %v1122_v43  ;;  %1771 = vmatprep.mubr.msk.f32.mxu1 %vm1890_vm3, %v1889_v29 }
 0x43b   :  { %1772 = vmatmul.mubr.f32.vlgmr.msra.gmra.mrb[2].mxu1 %v1187_v44 }
 0x4e2   :  { %v1107_v9 = vpop.f32.mrb[0].mxu1 }
 0x4e3   :  { %v1743_v53 = vpop.f32.mrb[1].mxu1 }
 0x50e   :  { %v1563_v54 = vpop.f32.mrb[2].mxu1 }
 0x50f   :  { %v1569_v55 = vrot.slane %v1563_v54, 7  ;;  %v1773_v56 = vpop.f32.mrb[3].mxu1 }
 0x511   :  { %v1570_v57 = vsel %vm594_vm1, %v1569_v55, %v1107_v9 }
 0x512   :  { %1573 = vst.msk [vmem:[#allocation2] sm:$0x3] %vm1572_vm5, %v1570_v57 }
 0x513   :  { %1875 = shalt.err (!%p1872_p4)
}
 0x514   :  { %s1876_s28 = scalar_lea.hbm %s2047_s3, 32 }
 0x515   :  { %p1877_p5 = scmp.ne.s32.totalorder %s2047_s3, %s1876_s28  ;;  %p1880_p6 = scmp.lt.u32.totalorder %s1876_s28, %s2047_s3 }
 0x517   :  { %p1882_p7 = pnand %p1880_p6, %p1877_p5 }
 0x519   :  { %1885 = shalt.err (!%p1882_p7)
}
 0x51a   :  { %1583 = dma.vmem_to_hbm [thread:$0]  %s1581_s24, 32, %s2047_s3, [#allocation3]  }
 0x51b   :  { %1886 = dma.done.wait [#allocation3], 32  }
 0x51c   :  { %1887 = vsyncadd [#allocation3], 4294967264 }
 0x51d   :  { %1587 = vsyncpa [#allocation3], 1 }

</bundles_post_ra>
